<compile_context>
chip_gen: v5e
topology: v5e:2x2
jax: 0.10.0
libtpu: 0.0.40
codegen_flags: <defaults>
</compile_context>

<pallas_src>
import jax
import jax.numpy as jnp
from jax.experimental import pallas as pl
from jax.experimental.pallas import tpu as pltpu


def _round_up(n, m):
    return ((n + m - 1) // m) * m


def ex_mlp_kernel(x_ref, w2_ref, b2_ref, w3_ref, b3_ref, wo_ref, bo_ref, o_ref):
    # x tile: (block_b, Dp) bf16; weights bf16 (in, out); biases f32 (1, out).
    x = x_ref[...]

    # layer2: Linear + ReLU   (Dropout == identity at inference)
    h = jnp.dot(x, w2_ref[...], preferred_element_type=jnp.float32) + b2_ref[...]
    h = jnp.maximum(h, 0.0)

    # layer3: Linear + ReLU
    h = jnp.dot(h.astype(jnp.bfloat16), w3_ref[...],
                preferred_element_type=jnp.float32) + b3_ref[...]
    h = jnp.maximum(h, 0.0)

    # output: Linear (bf16 writeback; wrapper upcasts / slices real columns)
    o = jnp.dot(h.astype(jnp.bfloat16), wo_ref[...],
                preferred_element_type=jnp.float32) + bo_ref[...]
    o_ref[...] = o.astype(o_ref.dtype)


def prepare_params(params, *, lane_align=128):
    """Zero-pad params to lane-dense shapes (multiples of `lane_align`) and cast
    the weight matrices to bf16.  Weights are stored (in, out) == W.T so the
    kernel computes x @ W.T + b exactly like torch.nn.Linear.  Zero padding is
    exact: padded columns stay zero through bias-add(0) + ReLU and contribute
    nothing to downstream matmuls.

    lane_align=128 is native on v5e's 128x128 MXU; use 256 on v6e/v7x once
    hidden_size is large enough for the matmuls to be the bottleneck."""
    w2, b2, w3, b3, wo, bo = params
    D, H = w2.shape
    O = wo.shape[1]
    Dp = _round_up(D, 128)
    Hp = _round_up(H, lane_align)
    Op = _round_up(O, lane_align)

    w2p = jnp.pad(w2, ((0, Dp - D), (0, Hp - H))).astype(jnp.bfloat16)
    b2p = jnp.pad(b2, ((0, 0), (0, Hp - H))).astype(jnp.float32)
    w3p = jnp.pad(w3, ((0, Hp - H), (0, Hp - H))).astype(jnp.bfloat16)
    b3p = jnp.pad(b3, ((0, 0), (0, Hp - H))).astype(jnp.float32)
    wop = jnp.pad(wo, ((0, Hp - H), (0, Op - O))).astype(jnp.bfloat16)
    bop = jnp.pad(bo, ((0, 0), (0, Op - O))).astype(jnp.float32)
    return (w2p, b2p, w3p, b3p, wop, bop), (D, H, O)


def _const_spec(shape, pipeline_mode):
    # Constant-index operand (weights / biases): same block every grid step.
    if pipeline_mode is None:
        return pl.BlockSpec(shape, lambda i: (0, 0))
    return pl.BlockSpec(shape, lambda i: (0, 0), pipeline_mode=pipeline_mode)


def ex_mlp_forward(x, padded_params, output_size, *, block_b=512):
    """x: (B, 4, input_size) float.  padded_params: output of prepare_params.
    Returns (B, output_size) float32."""
    w2, b2, w3, b3, wo, bo = padded_params
    Dp, Hp = w2.shape
    Op = wo.shape[1]

    B = x.shape[0]
    x2 = x.reshape(B, -1)                   # Flatten (glue, plain JAX)
    D = x2.shape[1]
    assert D <= Dp, "flattened input wider than prepared params"

    # bf16 feed: the kernel truncates to bf16 before the first dot anyway, so
    # this halves the dominant HBM read with identical numerics.  XLA fuses the
    # cast with the reshape / (optional) pad below into one op.
    x2 = x2.astype(jnp.bfloat16)

    # Pad only what correctness requires: batch rows to the bf16 sublane
    # quantum (16), feature columns to lane-dense Dp.  No full-batch pad copy:
    # partial last tiles are handled by the cdiv grid (rows never mix in a
    # matmul and out-of-bounds rows are never written back).
    B16 = _round_up(B, 16)
    if B16 != B or Dp != D:
        x2 = jnp.pad(x2, ((0, B16 - B), (0, Dp - D)))

    # Batch tiling: large tiles amortize per-grid-step overhead; tiny batches
    # collapse to one 16-row tile.
    block_b = _round_up(max(16, min(block_b, B16)), 16)
    grid_b = pl.cdiv(B16, block_b)
    # v7x megacore: ensure mid/large batches produce >= 2 parallel grid steps.
    if grid_b == 1 and B16 > 128:
        block_b = _round_up(pl.cdiv(B16, 2), 16)
        grid_b = pl.cdiv(B16, block_b)

    def run(weight_mode):
        in_specs = [
            pl.BlockSpec((block_b, Dp), lambda i: (i, 0)),   # x tile (bf16)
            _const_spec((Dp, Hp), weight_mode),              # w2 (in, out) bf16
            _const_spec((1, Hp), weight_mode),               # b2 f32
            _const_spec((Hp, Hp), weight_mode),              # w3 bf16
            _const_spec((1, Hp), weight_mode),               # b3 f32
            _const_spec((Hp, Op), weight_mode),              # wo bf16
            _const_spec((1, Op), weight_mode),               # bo f32
        ]
        return pl.pallas_call(
            ex_mlp_kernel,
            out_shape=jax.ShapeDtypeStruct((B16, Op), jnp.bfloat16),
            grid=(grid_b,),
            in_specs=in_specs,
            out_specs=pl.BlockSpec((block_b, Op), lambda i: (i, 0)),
            compiler_params=pltpu.CompilerParams(
                dimension_semantics=("parallel",)),
        )(x2, w2, b2, w3, b3, wo, bo)

    # Single-buffer the constant weight/bias operands (their block never
    # changes across the grid); fall back to default double-buffering if this
    # jax build does not support BlockSpec.pipeline_mode.
    try:
        out = run(pl.Buffered(1))
    except Exception:
        out = run(None)

    return out[:B, :output_size].astype(jnp.float32)


def init_params(key, input_size, hidden_size, output_size):
    """Deterministic synthetic init matching torch.nn.Linear shapes.
    PyTorch W is (out, in); we store W.T = (in, out)."""
    d_in = input_size * 4
    k = jax.random.split(key, 6)

    def uniform(key, shape, fan_in):
        bound = 1.0 / jnp.sqrt(fan_in)
        return jax.random.uniform(key, shape, jnp.float32, -bound, bound)

    w2 = uniform(k[0], (d_in, hidden_size), d_in)             # layer2.weight.T
    b2 = uniform(k[1], (1, hidden_size), d_in)                # layer2.bias
    w3 = uniform(k[2], (hidden_size, hidden_size), hidden_size)
    b3 = uniform(k[3], (1, hidden_size), hidden_size)
    wo = uniform(k[4], (hidden_size, output_size), hidden_size)
    bo = uniform(k[5], (1, output_size), hidden_size)
    return (w2, b2, w3, b3, wo, bo)


def reference_forward_f32(x, params):
    """Pure-f32 reference matching the PyTorch module semantics."""
    w2, b2, w3, b3, wo, bo = params
    h = x.reshape(x.shape[0], -1)
    h = jnp.maximum(h @ w2 + b2, 0.0)
    h = jnp.maximum(h @ w3 + b3, 0.0)
    return h @ wo + bo


def reference_forward_bf16(x, params):
    """Reference with the same bf16-in / f32-accumulate matmuls and bf16
    output writeback used by the kernel (for a tight numerical comparison)."""
    w2, b2, w3, b3, wo, bo = params
    bf = jnp.bfloat16

    def mm(a, w):
        return jnp.dot(a.astype(bf), w.astype(bf),
                       preferred_element_type=jnp.float32)

    h = x.reshape(x.shape[0], -1).astype(jnp.float32)
    h = jnp.maximum(mm(h, w2) + b2, 0.0)
    h = jnp.maximum(mm(h, w3) + b3, 0.0)
    o = mm(h, wo) + bo
    return o.astype(bf).astype(jnp.float32)


if __name__ == "__main__":
    # Shapes consistent with the module: input_size=32 per segment, 4 segments
    # -> Flatten gives in_features = input_size*4 = 128.  XNLI: 3 classes.
    input_size, hidden_size, output_size = 32, 32, 3

    key = jax.random.PRNGKey(0)
    kx, kp = jax.random.split(key)
    params = init_params(kp, input_size, hidden_size, output_size)
    padded_params, _ = prepare_params(params)

    def check(batch, block_b):
        xk = jax.random.fold_in(kx, batch)
        x = jax.random.normal(xk, (batch, 4, input_size), jnp.float32)
        out = jax.block_until_ready(
            ex_mlp_forward(x, padded_params, output_size, block_b=block_b))
        assert out.shape == (batch, output_size)
        # Tight check vs. a reference using identical bf16-in / f32-acc matmuls
        # and bf16 output rounding.
        ref_bf16 = reference_forward_bf16(x, params)
        assert jnp.allclose(out, ref_bf16, atol=1e-2, rtol=1e-2), \
            f"mismatch vs bf16-matched JAX reference (batch={batch})"
        # Loose check vs. the pure-f32 PyTorch-semantics reference.
        ref_f32 = reference_forward_f32(x, params)
        assert jnp.allclose(out, ref_f32, atol=5e-2, rtol=5e-2), \
            f"mismatch vs f32 JAX reference (batch={batch})"

    check(batch=8, block_b=512)    # tiny batch: one padded 16-row tile
    check(batch=64, block_b=512)   # one full tile, zero padding / copies
    check(batch=80, block_b=32)    # multi-step grid + masked partial last tile

    print("KERNEL_OK")
</pallas_src>

<mosaic_0001>
module attributes {stable_mosaic.version = 11 : i64} {
  func.func @ex_mlp_kernel(%arg0: i32, %arg1: memref<16x128xbf16, #tpu.memory_space<vmem>>, %arg2: memref<128x128xbf16, #tpu.memory_space<vmem>>, %arg3: memref<1x128xf32, #tpu.memory_space<vmem>>, %arg4: memref<128x128xbf16, #tpu.memory_space<vmem>>, %arg5: memref<1x128xf32, #tpu.memory_space<vmem>>, %arg6: memref<128x128xbf16, #tpu.memory_space<vmem>>, %arg7: memref<1x128xf32, #tpu.memory_space<vmem>>, %arg8: memref<16x128xbf16, #tpu.memory_space<vmem>>) attributes {dimension_semantics = [#tpu.dimension_semantics<parallel>], iteration_bounds = array<i64: 1>, scalar_prefetch = 0 : i64, scratch_operands = 0 : i64, tpu.core_type = #tpu.core_type<tc>, window_params = [{transform_indices = @transform_0, window_bounds = array<i64: 16, 128>}, {pipeline_mode = #tpu.pipeline_mode<synchronous>, transform_indices = @transform_1, window_bounds = array<i64: 128, 128>}, {pipeline_mode = #tpu.pipeline_mode<synchronous>, transform_indices = @transform_2, window_bounds = array<i64: 1, 128>}, {pipeline_mode = #tpu.pipeline_mode<synchronous>, transform_indices = @transform_3, window_bounds = array<i64: 128, 128>}, {pipeline_mode = #tpu.pipeline_mode<synchronous>, transform_indices = @transform_4, window_bounds = array<i64: 1, 128>}, {pipeline_mode = #tpu.pipeline_mode<synchronous>, transform_indices = @transform_5, window_bounds = array<i64: 128, 128>}, {pipeline_mode = #tpu.pipeline_mode<synchronous>, transform_indices = @transform_6, window_bounds = array<i64: 1, 128>}, {transform_indices = @transform_7, window_bounds = array<i64: 16, 128>}]} {
    %c0 = arith.constant 0 : index
    %c0_0 = arith.constant 0 : index
    %0 = vector.load %arg1[%c0, %c0_0] : memref<16x128xbf16, #tpu.memory_space<vmem>>, vector<16x128xbf16>
    %c0_1 = arith.constant 0 : index
    %c0_2 = arith.constant 0 : index
    %1 = vector.load %arg2[%c0_1, %c0_2] : memref<128x128xbf16, #tpu.memory_space<vmem>>, vector<128x128xbf16>
    %cst = arith.constant dense<0.000000e+00> : vector<16x128xf32>
    %2 = tpu.matmul %0, %1, %cst {dimension_numbers = #tpu.dot_dimension_numbers<[1], [0], [0], [1], [0, 0, 1, 1], [], []>} : vector<16x128xbf16>, vector<128x128xbf16>, vector<16x128xf32> -> vector<16x128xf32>
    %c0_3 = arith.constant 0 : index
    %c0_4 = arith.constant 0 : index
    %3 = vector.load %arg3[%c0_3, %c0_4] : memref<1x128xf32, #tpu.memory_space<vmem>>, vector<1x128xf32>
    %4 = vector.broadcast %3 : vector<1x128xf32> to vector<16x128xf32>
    %5 = arith.addf %2, %4 : vector<16x128xf32>
    %cst_5 = arith.constant 0.000000e+00 : f32
    %6 = vector.broadcast %cst_5 : f32 to vector<16x128xf32>
    %7 = arith.maximumf %5, %6 : vector<16x128xf32>
    %8 = arith.truncf %7 : vector<16x128xf32> to vector<16x128xbf16>
    %c0_6 = arith.constant 0 : index
    %c0_7 = arith.constant 0 : index
    %9 = vector.load %arg4[%c0_6, %c0_7] : memref<128x128xbf16, #tpu.memory_space<vmem>>, vector<128x128xbf16>
    %cst_8 = arith.constant dense<0.000000e+00> : vector<16x128xf32>
    %10 = tpu.matmul %8, %9, %cst_8 {dimension_numbers = #tpu.dot_dimension_numbers<[1], [0], [0], [1], [0, 0, 1, 1], [], []>} : vector<16x128xbf16>, vector<128x128xbf16>, vector<16x128xf32> -> vector<16x128xf32>
    %c0_9 = arith.constant 0 : index
    %c0_10 = arith.constant 0 : index
    %11 = vector.load %arg5[%c0_9, %c0_10] : memref<1x128xf32, #tpu.memory_space<vmem>>, vector<1x128xf32>
    %12 = vector.broadcast %11 : vector<1x128xf32> to vector<16x128xf32>
    %13 = arith.addf %10, %12 : vector<16x128xf32>
    %cst_11 = arith.constant 0.000000e+00 : f32
    %14 = vector.broadcast %cst_11 : f32 to vector<16x128xf32>
    %15 = arith.maximumf %13, %14 : vector<16x128xf32>
    %16 = arith.truncf %15 : vector<16x128xf32> to vector<16x128xbf16>
    %c0_12 = arith.constant 0 : index
    %c0_13 = arith.constant 0 : index
    %17 = vector.load %arg6[%c0_12, %c0_13] : memref<128x128xbf16, #tpu.memory_space<vmem>>, vector<128x128xbf16>
    %cst_14 = arith.constant dense<0.000000e+00> : vector<16x128xf32>
    %18 = tpu.matmul %16, %17, %cst_14 {dimension_numbers = #tpu.dot_dimension_numbers<[1], [0], [0], [1], [0, 0, 1, 1], [], []>} : vector<16x128xbf16>, vector<128x128xbf16>, vector<16x128xf32> -> vector<16x128xf32>
    %c0_15 = arith.constant 0 : index
    %c0_16 = arith.constant 0 : index
    %19 = vector.load %arg7[%c0_15, %c0_16] : memref<1x128xf32, #tpu.memory_space<vmem>>, vector<1x128xf32>
    %20 = vector.broadcast %19 : vector<1x128xf32> to vector<16x128xf32>
    %21 = arith.addf %18, %20 : vector<16x128xf32>
    %22 = arith.truncf %21 : vector<16x128xf32> to vector<16x128xbf16>
    %c0_17 = arith.constant 0 : index
    %c0_18 = arith.constant 0 : index
    %23 = vector.load %arg8[%c0_17, %c0_18] : memref<16x128xbf16, #tpu.memory_space<vmem>>, vector<16x128xbf16>
    tpu.vector_store %arg8[%c0_17, %c0_18], %22 {strides = array<i32>} : memref<16x128xbf16, #tpu.memory_space<vmem>>, vector<16x128xbf16>,
    return
  }
  func.func @transform_0(%arg0: i32) -> (i32, i32) {
    %c0_i32 = arith.constant 0 : i32
    %c0_i32_0 = arith.constant 0 : i32
    return %arg0, %c0_i32 : i32, i32
  }
  func.func @transform_1(%arg0: i32) -> (i32, i32) {
    %c0_i32 = arith.constant 0 : i32
    %c0_i32_0 = arith.constant 0 : i32
    %c0_i32_1 = arith.constant 0 : i32
    return %c0_i32, %c0_i32_0 : i32, i32
  }
  func.func @transform_2(%arg0: i32) -> (i32, i32) {
    %c0_i32 = arith.constant 0 : i32
    %c0_i32_0 = arith.constant 0 : i32
    %c0_i32_1 = arith.constant 0 : i32
    return %c0_i32, %c0_i32_0 : i32, i32
  }
  func.func @transform_3(%arg0: i32) -> (i32, i32) {
    %c0_i32 = arith.constant 0 : i32
    %c0_i32_0 = arith.constant 0 : i32
    %c0_i32_1 = arith.constant 0 : i32
    return %c0_i32, %c0_i32_0 : i32, i32
  }
  func.func @transform_4(%arg0: i32) -> (i32, i32) {
    %c0_i32 = arith.constant 0 : i32
    %c0_i32_0 = arith.constant 0 : i32
    %c0_i32_1 = arith.constant 0 : i32
    return %c0_i32, %c0_i32_0 : i32, i32
  }
  func.func @transform_5(%arg0: i32) -> (i32, i32) {
    %c0_i32 = arith.constant 0 : i32
    %c0_i32_0 = arith.constant 0 : i32
    %c0_i32_1 = arith.constant 0 : i32
    return %c0_i32, %c0_i32_0 : i32, i32
  }
  func.func @transform_6(%arg0: i32) -> (i32, i32) {
    %c0_i32 = arith.constant 0 : i32
    %c0_i32_0 = arith.constant 0 : i32
    %c0_i32_1 = arith.constant 0 : i32
    return %c0_i32, %c0_i32_0 : i32, i32
  }
  func.func @transform_7(%arg0: i32) -> (i32, i32) {
    %c0_i32 = arith.constant 0 : i32
    %c0_i32_0 = arith.constant 0 : i32
    return %arg0, %c0_i32 : i32, i32
  }
}

module attributes {stable_mosaic.version = 11 : i64} {
  func.func @ex_mlp_kernel(%arg0: i32, %arg1: memref<16x128xbf16, #tpu.memory_space<vmem>>, %arg2: memref<128x128xbf16, #tpu.memory_space<vmem>>, %arg3: memref<1x128xf32, #tpu.memory_space<vmem>>, %arg4: memref<128x128xbf16, #tpu.memory_space<vmem>>, %arg5: memref<1x128xf32, #tpu.memory_space<vmem>>, %arg6: memref<128x128xbf16, #tpu.memory_space<vmem>>, %arg7: memref<1x128xf32, #tpu.memory_space<vmem>>, %arg8: memref<16x128xbf16, #tpu.memory_space<vmem>>) attributes {dimension_semantics = [#tpu.dimension_semantics<parallel>], iteration_bounds = array<i64: 1>, scalar_prefetch = 0 : i64, scratch_operands = 0 : i64, tpu.core_type = #tpu.core_type<tc>, window_params = [{transform_indices = @transform_0, window_bounds = array<i64: 16, 128>}, {pipeline_mode = #tpu.pipeline_mode<synchronous>, transform_indices = @transform_1, window_bounds = array<i64: 128, 128>}, {pipeline_mode = #tpu.pipeline_mode<synchronous>, transform_indices = @transform_2, window_bounds = array<i64: 1, 128>}, {pipeline_mode = #tpu.pipeline_mode<synchronous>, transform_indices = @transform_3, window_bounds = array<i64: 128, 128>}, {pipeline_mode = #tpu.pipeline_mode<synchronous>, transform_indices = @transform_4, window_bounds = array<i64: 1, 128>}, {pipeline_mode = #tpu.pipeline_mode<synchronous>, transform_indices = @transform_5, window_bounds = array<i64: 128, 128>}, {pipeline_mode = #tpu.pipeline_mode<synchronous>, transform_indices = @transform_6, window_bounds = array<i64: 1, 128>}, {transform_indices = @transform_7, window_bounds = array<i64: 16, 128>}]} {
    %c0 = arith.constant 0 : index
    %c0_0 = arith.constant 0 : index
    %0 = vector.load %arg1[%c0, %c0_0] : memref<16x128xbf16, #tpu.memory_space<vmem>>, vector<16x128xbf16>
    %c0_1 = arith.constant 0 : index
    %c0_2 = arith.constant 0 : index
    %1 = vector.load %arg2[%c0_1, %c0_2] : memref<128x128xbf16, #tpu.memory_space<vmem>>, vector<128x128xbf16>
    %cst = arith.constant dense<0.000000e+00> : vector<16x128xf32>
    %2 = tpu.matmul %0, %1, %cst {dimension_numbers = #tpu.dot_dimension_numbers<[1], [0], [0], [1], [0, 0, 1, 1], [], []>} : vector<16x128xbf16>, vector<128x128xbf16>, vector<16x128xf32> -> vector<16x128xf32>
    %c0_3 = arith.constant 0 : index
    %c0_4 = arith.constant 0 : index
    %3 = vector.load %arg3[%c0_3, %c0_4] : memref<1x128xf32, #tpu.memory_space<vmem>>, vector<1x128xf32>
    %4 = vector.broadcast %3 : vector<1x128xf32> to vector<16x128xf32>
    %5 = arith.addf %2, %4 : vector<16x128xf32>
    %cst_5 = arith.constant 0.000000e+00 : f32
    %6 = vector.broadcast %cst_5 : f32 to vector<16x128xf32>
    %7 = arith.maximumf %5, %6 : vector<16x128xf32>
    %8 = arith.truncf %7 : vector<16x128xf32> to vector<16x128xbf16>
    %c0_6 = arith.constant 0 : index
    %c0_7 = arith.constant 0 : index
    %9 = vector.load %arg4[%c0_6, %c0_7] : memref<128x128xbf16, #tpu.memory_space<vmem>>, vector<128x128xbf16>
    %cst_8 = arith.constant dense<0.000000e+00> : vector<16x128xf32>
    %10 = tpu.matmul %8, %9, %cst_8 {dimension_numbers = #tpu.dot_dimension_numbers<[1], [0], [0], [1], [0, 0, 1, 1], [], []>} : vector<16x128xbf16>, vector<128x128xbf16>, vector<16x128xf32> -> vector<16x128xf32>
    %c0_9 = arith.constant 0 : index
    %c0_10 = arith.constant 0 : index
    %11 = vector.load %arg5[%c0_9, %c0_10] : memref<1x128xf32, #tpu.memory_space<vmem>>, vector<1x128xf32>
    %12 = vector.broadcast %11 : vector<1x128xf32> to vector<16x128xf32>
    %13 = arith.addf %10, %12 : vector<16x128xf32>
    %cst_11 = arith.constant 0.000000e+00 : f32
    %14 = vector.broadcast %cst_11 : f32 to vector<16x128xf32>
    %15 = arith.maximumf %13, %14 : vector<16x128xf32>
    %16 = arith.truncf %15 : vector<16x128xf32> to vector<16x128xbf16>
    %c0_12 = arith.constant 0 : index
    %c0_13 = arith.constant 0 : index
    %17 = vector.load %arg6[%c0_12, %c0_13] : memref<128x128xbf16, #tpu.memory_space<vmem>>, vector<128x128xbf16>
    %cst_14 = arith.constant dense<0.000000e+00> : vector<16x128xf32>
    %18 = tpu.matmul %16, %17, %cst_14 {dimension_numbers = #tpu.dot_dimension_numbers<[1], [0], [0], [1], [0, 0, 1, 1], [], []>} : vector<16x128xbf16>, vector<128x128xbf16>, vector<16x128xf32> -> vector<16x128xf32>
    %c0_15 = arith.constant 0 : index
    %c0_16 = arith.constant 0 : index
    %19 = vector.load %arg7[%c0_15, %c0_16] : memref<1x128xf32, #tpu.memory_space<vmem>>, vector<1x128xf32>
    %20 = vector.broadcast %19 : vector<1x128xf32> to vector<16x128xf32>
    %21 = arith.addf %18, %20 : vector<16x128xf32>
    %22 = arith.truncf %21 : vector<16x128xf32> to vector<16x128xbf16>
    %c0_17 = arith.constant 0 : index
    %c0_18 = arith.constant 0 : index
    %23 = vector.load %arg8[%c0_17, %c0_18] : memref<16x128xbf16, #tpu.memory_space<vmem>>, vector<16x128xbf16>
    tpu.vector_store %arg8[%c0_17, %c0_18], %22 {strides = array<i32>} : memref<16x128xbf16, #tpu.memory_space<vmem>>, vector<16x128xbf16>,
    return
  }
  func.func @transform_0(%arg0: i32) -> (i32, i32) {
    %c0_i32 = arith.constant 0 : i32
    %c0_i32_0 = arith.constant 0 : i32
    return %arg0, %c0_i32 : i32, i32
  }
  func.func @transform_1(%arg0: i32) -> (i32, i32) {
    %c0_i32 = arith.constant 0 : i32
    %c0_i32_0 = arith.constant 0 : i32
    %c0_i32_1 = arith.constant 0 : i32
    return %c0_i32, %c0_i32_0 : i32, i32
  }
  func.func @transform_2(%arg0: i32) -> (i32, i32) {
    %c0_i32 = arith.constant 0 : i32
    %c0_i32_0 = arith.constant 0 : i32
    %c0_i32_1 = arith.constant 0 : i32
    return %c0_i32, %c0_i32_0 : i32, i32
  }
  func.func @transform_3(%arg0: i32) -> (i32, i32) {
    %c0_i32 = arith.constant 0 : i32
    %c0_i32_0 = arith.constant 0 : i32
    %c0_i32_1 = arith.constant 0 : i32
    return %c0_i32, %c0_i32_0 : i32, i32
  }
  func.func @transform_4(%arg0: i32) -> (i32, i32) {
    %c0_i32 = arith.constant 0 : i32
    %c0_i32_0 = arith.constant 0 : i32
    %c0_i32_1 = arith.constant 0 : i32
    return %c0_i32, %c0_i32_0 : i32, i32
  }
  func.func @transform_5(%arg0: i32) -> (i32, i32) {
    %c0_i32 = arith.constant 0 : i32
    %c0_i32_0 = arith.constant 0 : i32
    %c0_i32_1 = arith.constant 0 : i32
    return %c0_i32, %c0_i32_0 : i32, i32
  }
  func.func @transform_6(%arg0: i32) -> (i32, i32) {
    %c0_i32 = arith.constant 0 : i32
    %c0_i32_0 = arith.constant 0 : i32
    %c0_i32_1 = arith.constant 0 : i32
    return %c0_i32, %c0_i32_0 : i32, i32
  }
  func.func @transform_7(%arg0: i32) -> (i32, i32) {
    %c0_i32 = arith.constant 0 : i32
    %c0_i32_0 = arith.constant 0 : i32
    return %arg0, %c0_i32 : i32, i32
  }
}

</mosaic_0001>

<bundles_post_ra>
// kernel: tpu_custom_call.1
= control target key start
LH: loop header
LB: loop body
LE: loop exit
PB: predicated region body
PF: predicated region fallthrough
CT: control target
= control target key end

     0   :  { %12 = vsyncpa [#allocation3], 0  ;;  %s729_s0 = inlined_call_operand.hbm [shape: bf16[16,128], index: 0, kind: input, shape index: {}]   ;;  %s730_s1 = inlined_call_operand.hbm [shape: bf16[128,128], index: 1, kind: input, shape index: {}]   ;;  %s731_s2 = inlined_call_operand.vmem [shape: f32[1,128], index: 2, kind: input, shape index: {}]   ;;  %s732_s3 = inlined_call_operand.hbm [shape: bf16[128,128], index: 3, kind: input, shape index: {}]   ;;  %s733_s4 = inlined_call_operand.vmem [shape: f32[1,128], index: 4, kind: input, shape index: {}]   ;;  %s734_s5 = inlined_call_operand.hbm [shape: bf16[128,128], index: 5, kind: input, shape index: {}]   ;;  %s735_s6 = inlined_call_operand.vmem [shape: f32[1,128], index: 6, kind: input, shape index: {}]   ;;  %s736_s7 = inlined_call_operand.hbm [shape: bf16[16,128], index: 7, kind: output, shape index: {}]  }
   0x1   :  { %13 = vsyncpa [#allocation6], 0 }
   0x2   :  { %14 = vsyncpa [#allocation9], 0 }
   0x3   :  { %15 = vsyncpa [#allocation4], 0  ;;  %s33_s26 = sshll.u32 %s730_s1, 4  ;;  %s643_s27 = smov [#allocation5]   ;;  %s34_s26 = int_to_ptr.hbm [resolvable:$true] %s33_s26 }
   0x4   :  { %s35_s28 = sshll.u32 %s643_s27, 4  ;;  %s20_s8 = sshll.u32 %s729_s0, 4  ;;  %s36_s28 = int_to_ptr.vmem [resolvable:$true] %s35_s28  ;;  %s21_s8 = int_to_ptr.hbm [resolvable:$true] %s20_s8 }
   0x5   :  { %s644_s9 = smov 64   ;;  %s645_s10 = smov 4  }
   0x6   :  { %41 = dma.hbm_to_vmem [thread:$0]  %s34_s26, 1024, %s36_s28, [#allocation6], %s644_s9, %s644_s9, %s645_s10  }
   0x7   :  { %s646_s11 = smov [#allocation2]   ;;  %s48_s1 = sshll.u32 %s732_s3, 4  ;;  %s49_s1 = int_to_ptr.hbm [resolvable:$true] %s48_s1 }
   0x8   :  { %s22_s12 = sshll.u32 %s646_s11, 4  ;;  %s63_s16 = sshll.u32 %s734_s5, 4  ;;  %s23_s12 = int_to_ptr.vmem [resolvable:$true] %s22_s12  ;;  %s64_s16 = int_to_ptr.hbm [resolvable:$true] %s63_s16 }
   0x9   :  { %28 = dma.hbm_to_vmem [thread:$0]  %s21_s8, 128, %s23_s12, [#allocation3], %s644_s9, %s644_s9, %s645_s10  }
   0xa   :  { %s647_s17 = smov [#allocation7]   ;;  %s648_s19 = smov [#allocation8]  }
   0xb   :  { %s50_s18 = sshll.u32 %s647_s17, 4  ;;  %s65_s3 = sshll.u32 %s648_s19, 4  ;;  %s51_s18 = int_to_ptr.vmem [resolvable:$true] %s50_s18  ;;  %s66_s3 = int_to_ptr.vmem [resolvable:$true] %s65_s3 }
   0xc   :  { %56 = dma.hbm_to_vmem [thread:$0]  %s49_s1, 1024, %s51_s18, [#allocation6], %s644_s9, %s644_s9, %s645_s10  }
   0xd   :  { %71 = dma.hbm_to_vmem [thread:$0]  %s64_s16, 1024, %s66_s3, [#allocation9], %s644_s9, %s644_s9, %s645_s10  }
   0xe   :  { %635 = dma.done.wait [#allocation3], 128  }
   0xf   :  { %636 = vsyncadd [#allocation3], 4294967168 }
  0x10   :  { %637 = dma.done.wait [#allocation6], 2048  }
  0x11   :  { %638 = vsyncadd [#allocation6], 4294965248 }
  0x12   :  { %639 = dma.done.wait [#allocation9], 1024  }
  0x13   :  { %640 = vsyncadd [#allocation9], 4294966272  ;;  %v483_v0 = vld [vmem:[#allocation5 + $0x38] sm:$0xff]  ;;  %v482_v1 = vld [vmem:[#allocation5 + $0x30] sm:$0xff]  ;;  %s649_s24 = smov [#allocation10]   ;;  %s360_s28 = sshll.u32 %s736_s7, 4  ;;  %s361_s28 = int_to_ptr.hbm [resolvable:$true] %s360_s28 }
  0x14   :  { %166 = vmatpush.bf16.msra.mxu0 %v483_v0  ;;  %v491_v2 = vld [vmem:[#allocation7 + $0x38] sm:$0xff]  ;;  %v490_v3 = vld [vmem:[#allocation7 + $0x30] sm:$0xff]  ;;  %v481_v4 = vld [vmem:[#allocation5 + $0x28] sm:$0xff]  ;;  %s358_s25 = sshll.u32 %s649_s24, 4  ;;  %s359_s25 = int_to_ptr.vmem [resolvable:$true] %s358_s25 }
  0x15   :  { %251 = vmatpush.bf16.msra.mxu1 %v491_v2  ;;  %v489_v5 = vld [vmem:[#allocation7 + $0x28] sm:$0xff]  ;;  %v480_v6 = vld [vmem:[#allocation5 + $0x20] sm:$0xff]  ;;  %v479_v8 = vld [vmem:[#allocation5 + $0x18] sm:$0xff] }
  0x16   :  { %v488_v7 = vld [vmem:[#allocation7 + $0x20] sm:$0xff]  ;;  %v478_v9 = vld [vmem:[#allocation5 + $0x10] sm:$0xff]  ;;  %v477_v10 = vld [vmem:[#allocation5 + $0x8] sm:$0xff] }
  0x17   :  { %v476_v11 = vld [vmem:[#allocation5] sm:$0xff]  ;;  %v475_v12 = vld [vmem:[#allocation2] sm:$0xff]  ;;  %v486_v14 = vld [vmem:[#allocation7 + $0x10] sm:$0xff] }
  0x18   :  { %167 = vmatpush.bf16.msra.mxu0 %v482_v1  ;;  %v487_v13 = vld [vmem:[#allocation7 + $0x18] sm:$0xff]  ;;  %v485_v15 = vld [vmem:[#allocation7 + $0x8] sm:$0xff]  ;;  %v484_v16 = vld [vmem:[#allocation7] sm:$0xff] }
  0x19   :  { %252 = vmatpush.bf16.msra.mxu1 %v490_v3  ;;  %v499_v17 = vld [vmem:[#allocation8 + $0x38] sm:$0xff]  ;;  %v498_v18 = vld [vmem:[#allocation8 + $0x30] sm:$0xff]  ;;  %v497_v19 = vld [vmem:[#allocation8 + $0x28] sm:$0xff] }
  0x1a   :  { %336 = vmatpush.bf16.msra.mxu2 %v499_v17  ;;  %v496_v20 = vld [vmem:[#allocation8 + $0x20] sm:$0xff]  ;;  %v512_v22 = vld [vmem:[%s731_s2] ss:$0 sm:$0xff]  ;;  %v494_v30 = vld [vmem:[#allocation8 + $0x10] sm:$0xff] }
  0x1b   :  { %v495_v29 = vld [vmem:[#allocation8 + $0x18] sm:$0xff]  ;;  %v493_v31 = vld [vmem:[#allocation8 + $0x8] sm:$0xff]  ;;  %v492_v32 = vld [vmem:[#allocation8] sm:$0xff] }
  0x1c   :  { %168 = vmatpush.bf16.msra.mxu0 %v481_v4  ;;  %v513_v34 = vld [vmem:[%s733_s4] ss:$0 sm:$0xff] }
  0x1d   :  { %253 = vmatpush.bf16.msra.mxu1 %v489_v5  ;;  %v514_v42 = vld [vmem:[%s735_s6] ss:$0 sm:$0xff] }
  0x1e   :  { %337 = vmatpush.bf16.msra.mxu2 %v498_v18 }
  0x20   :  { %169 = vmatpush.bf16.msra.mxu0 %v480_v6 }
  0x21   :  { %254 = vmatpush.bf16.msra.mxu1 %v488_v7 }
  0x22   :  { %338 = vmatpush.bf16.msra.mxu2 %v497_v19 }
  0x24   :  { %170 = vmatpush.bf16.msra.mxu0 %v479_v8 }
  0x25   :  { %255 = vmatpush.bf16.msra.mxu1 %v487_v13 }
  0x26   :  { %339 = vmatpush.bf16.msra.mxu2 %v496_v20 }
  0x28   :  { %171 = vmatpush.bf16.msra.mxu0 %v478_v9 }
  0x29   :  { %256 = vmatpush.bf16.msra.mxu1 %v486_v14 }
  0x2a   :  { %340 = vmatpush.bf16.msra.mxu2 %v495_v29 }
  0x2c   :  { %172 = vmatpush.bf16.msra.mxu0 %v477_v10 }
  0x2d   :  { %257 = vmatpush.bf16.msra.mxu1 %v485_v15 }
  0x2e   :  { %341 = vmatpush.bf16.msra.mxu2 %v494_v30 }
  0x30   :  { %173 = vmatpush.bf16.msra.mxu0 %v476_v11 }
  0x31   :  { %258 = vmatpush.bf16.msra.mxu1 %v484_v16 }
  0x32   :  { %342 = vmatpush.bf16.msra.mxu2 %v493_v31 }
  0x33   :  { %174 = vmatmul.bf16.vlgmr.msra.gmra.mxu0 %v475_v12 }
  0x36   :  { %343 = vmatpush.bf16.msra.mxu2 %v492_v32 }
  0xb0   :  { %v175_v21 = vpop.f32.mrf.mxu0 }
  0xb1   :  { %v176_v23 = vadd.f32 %v512_v22, %v175_v21 }
  0xb3   :  { %v180_v26 = vmax.f32 %v176_v23, 0.0 }
  0xb8   :  { %v177_v24 = vpop.f32.mrf.mxu0 }
  0xb9   :  { %v178_v25 = vadd.f32 %v512_v22, %v177_v24 }
  0xbb   :  { %v181_v27 = vmax.f32 %v178_v25, 0.0 }
  0xbd   :  { %v182_v28 = vpack.c.bf16 %v181_v27, %v180_v26 }
  0xbf   :  { %259 = vmatmul.bf16.vlgmr.msra.gmra.mxu1 %v182_v28 }
 0x13c   :  { %v260_v33 = vpop.f32.mrf.mxu1 }
 0x13d   :  { %v261_v35 = vadd.f32 %v513_v34, %v260_v33 }
 0x13f   :  { %v265_v38 = vmax.f32 %v261_v35, 0.0 }
 0x144   :  { %v262_v36 = vpop.f32.mrf.mxu1 }
 0x145   :  { %v263_v37 = vadd.f32 %v513_v34, %v262_v36 }
 0x147   :  { %v266_v39 = vmax.f32 %v263_v37, 0.0 }
 0x149   :  { %v267_v40 = vpack.c.bf16 %v266_v39, %v265_v38 }
 0x14b   :  { %344 = vmatmul.bf16.vlgmr.msra.gmra.mxu2 %v267_v40 }
 0x1ce   :  { %v345_v41 = vpop.f32.mrf.mxu2 }
 0x1cf   :  { %v346_v44 = vadd.f32 %v514_v42, %v345_v41 }
 0x1d6   :  { %v347_v43 = vpop.f32.mrf.mxu2 }
 0x1d7   :  { %v348_v45 = vadd.f32 %v514_v42, %v347_v43 }
 0x1d9   :  { %v503_v46 = vpack.c.bf16 %v348_v45, %v346_v44 }
 0x1db   :  { %504 = vst [vmem:[#allocation10] sm:$0xff] %v503_v46  }
 0x1dc   :  { %366 = dma.vmem_to_hbm [thread:$0]  %s359_s25, 128, %s361_s28, [#allocation4], %s644_s9, %s644_s9, %s645_s10  }
 0x1dd   :  { %641 = dma.done.wait [#allocation4], 128  }
 0x1de   :  { %642 = vsyncadd [#allocation4], 4294967168 }
 0x1df   :  { %371 = vsyncpa [#allocation3], 1 }
 0x1e0   :  { %372 = vsyncpa [#allocation6], 1 }
 0x1e1   :  { %373 = vsyncpa [#allocation9], 1 }
 0x1e2   :  { %374 = vsyncpa [#allocation4], 1 }

// kernel: tpu_custom_call.1
= control target key start
LH: loop header
LB: loop body
LE: loop exit
PB: predicated region body
PF: predicated region fallthrough
CT: control target
= control target key end

     0   :  { %12 = vsyncpa [#allocation3], 0  ;;  %s729_s0 = inlined_call_operand.hbm [shape: bf16[16,128], index: 0, kind: input, shape index: {}]   ;;  %s730_s1 = inlined_call_operand.hbm [shape: bf16[128,128], index: 1, kind: input, shape index: {}]   ;;  %s731_s2 = inlined_call_operand.vmem [shape: f32[1,128], index: 2, kind: input, shape index: {}]   ;;  %s732_s3 = inlined_call_operand.hbm [shape: bf16[128,128], index: 3, kind: input, shape index: {}]   ;;  %s733_s4 = inlined_call_operand.vmem [shape: f32[1,128], index: 4, kind: input, shape index: {}]   ;;  %s734_s5 = inlined_call_operand.hbm [shape: bf16[128,128], index: 5, kind: input, shape index: {}]   ;;  %s735_s6 = inlined_call_operand.vmem [shape: f32[1,128], index: 6, kind: input, shape index: {}]   ;;  %s736_s7 = inlined_call_operand.hbm [shape: bf16[16,128], index: 7, kind: output, shape index: {}]  }
   0x1   :  { %13 = vsyncpa [#allocation6], 0 }
   0x2   :  { %14 = vsyncpa [#allocation9], 0 }
   0x3   :  { %15 = vsyncpa [#allocation4], 0  ;;  %s33_s26 = sshll.u32 %s730_s1, 4  ;;  %s643_s27 = smov [#allocation5]   ;;  %s34_s26 = int_to_ptr.hbm [resolvable:$true] %s33_s26 }
   0x4   :  { %s35_s28 = sshll.u32 %s643_s27, 4  ;;  %s20_s8 = sshll.u32 %s729_s0, 4  ;;  %s36_s28 = int_to_ptr.vmem [resolvable:$true] %s35_s28  ;;  %s21_s8 = int_to_ptr.hbm [resolvable:$true] %s20_s8 }
   0x5   :  { %s644_s9 = smov 64   ;;  %s645_s10 = smov 4  }
   0x6   :  { %41 = dma.hbm_to_vmem [thread:$0]  %s34_s26, 1024, %s36_s28, [#allocation6], %s644_s9, %s644_s9, %s645_s10  }
   0x7   :  { %s646_s11 = smov [#allocation2]   ;;  %s48_s1 = sshll.u32 %s732_s3, 4  ;;  %s49_s1 = int_to_ptr.hbm [resolvable:$true] %s48_s1 }
   0x8   :  { %s22_s12 = sshll.u32 %s646_s11, 4  ;;  %s63_s16 = sshll.u32 %s734_s5, 4  ;;  %s23_s12 = int_to_ptr.vmem [resolvable:$true] %s22_s12  ;;  %s64_s16 = int_to_ptr.hbm [resolvable:$true] %s63_s16 }
   0x9   :  { %28 = dma.hbm_to_vmem [thread:$0]  %s21_s8, 128, %s23_s12, [#allocation3], %s644_s9, %s644_s9, %s645_s10  }
   0xa   :  { %s647_s17 = smov [#allocation7]   ;;  %s648_s19 = smov [#allocation8]  }
   0xb   :  { %s50_s18 = sshll.u32 %s647_s17, 4  ;;  %s65_s3 = sshll.u32 %s648_s19, 4  ;;  %s51_s18 = int_to_ptr.vmem [resolvable:$true] %s50_s18  ;;  %s66_s3 = int_to_ptr.vmem [resolvable:$true] %s65_s3 }
   0xc   :  { %56 = dma.hbm_to_vmem [thread:$0]  %s49_s1, 1024, %s51_s18, [#allocation6], %s644_s9, %s644_s9, %s645_s10  }
   0xd   :  { %71 = dma.hbm_to_vmem [thread:$0]  %s64_s16, 1024, %s66_s3, [#allocation9], %s644_s9, %s644_s9, %s645_s10  }
   0xe   :  { %635 = dma.done.wait [#allocation3], 128  }
   0xf   :  { %636 = vsyncadd [#allocation3], 4294967168 }
  0x10   :  { %637 = dma.done.wait [#allocation6], 2048  }
  0x11   :  { %638 = vsyncadd [#allocation6], 4294965248 }
  0x12   :  { %639 = dma.done.wait [#allocation9], 1024  }
  0x13   :  { %640 = vsyncadd [#allocation9], 4294966272  ;;  %v483_v0 = vld [vmem:[#allocation5 + $0x38] sm:$0xff]  ;;  %v482_v1 = vld [vmem:[#allocation5 + $0x30] sm:$0xff]  ;;  %s649_s24 = smov [#allocation10]   ;;  %s360_s28 = sshll.u32 %s736_s7, 4  ;;  %s361_s28 = int_to_ptr.hbm [resolvable:$true] %s360_s28 }
  0x14   :  { %166 = vmatpush.bf16.msra.mxu0 %v483_v0  ;;  %v491_v2 = vld [vmem:[#allocation7 + $0x38] sm:$0xff]  ;;  %v490_v3 = vld [vmem:[#allocation7 + $0x30] sm:$0xff]  ;;  %v481_v4 = vld [vmem:[#allocation5 + $0x28] sm:$0xff]  ;;  %s358_s25 = sshll.u32 %s649_s24, 4  ;;  %s359_s25 = int_to_ptr.vmem [resolvable:$true] %s358_s25 }
  0x15   :  { %251 = vmatpush.bf16.msra.mxu1 %v491_v2  ;;  %v489_v5 = vld [vmem:[#allocation7 + $0x28] sm:$0xff]  ;;  %v480_v6 = vld [vmem:[#allocation5 + $0x20] sm:$0xff]  ;;  %v479_v8 = vld [vmem:[#allocation5 + $0x18] sm:$0xff] }
  0x16   :  { %v488_v7 = vld [vmem:[#allocation7 + $0x20] sm:$0xff]  ;;  %v478_v9 = vld [vmem:[#allocation5 + $0x10] sm:$0xff]  ;;  %v477_v10 = vld [vmem:[#allocation5 + $0x8] sm:$0xff] }
  0x17   :  { %v476_v11 = vld [vmem:[#allocation5] sm:$0xff]  ;;  %v475_v12 = vld [vmem:[#allocation2] sm:$0xff]  ;;  %v486_v14 = vld [vmem:[#allocation7 + $0x10] sm:$0xff] }
  0x18   :  { %167 = vmatpush.bf16.msra.mxu0 %v482_v1  ;;  %v487_v13 = vld [vmem:[#allocation7 + $0x18] sm:$0xff]  ;;  %v485_v15 = vld [vmem:[#allocation7 + $0x8] sm:$0xff]  ;;  %v484_v16 = vld [vmem:[#allocation7] sm:$0xff] }
  0x19   :  { %252 = vmatpush.bf16.msra.mxu1 %v490_v3  ;;  %v499_v17 = vld [vmem:[#allocation8 + $0x38] sm:$0xff]  ;;  %v498_v18 = vld [vmem:[#allocation8 + $0x30] sm:$0xff]  ;;  %v497_v19 = vld [vmem:[#allocation8 + $0x28] sm:$0xff] }
  0x1a   :  { %336 = vmatpush.bf16.msra.mxu2 %v499_v17  ;;  %v496_v20 = vld [vmem:[#allocation8 + $0x20] sm:$0xff]  ;;  %v512_v22 = vld [vmem:[%s731_s2] ss:$0 sm:$0xff]  ;;  %v494_v30 = vld [vmem:[#allocation8 + $0x10] sm:$0xff] }
  0x1b   :  { %v495_v29 = vld [vmem:[#allocation8 + $0x18] sm:$0xff]  ;;  %v493_v31 = vld [vmem:[#allocation8 + $0x8] sm:$0xff]  ;;  %v492_v32 = vld [vmem:[#allocation8] sm:$0xff] }
  0x1c   :  { %168 = vmatpush.bf16.msra.mxu0 %v481_v4  ;;  %v513_v34 = vld [vmem:[%s733_s4] ss:$0 sm:$0xff] }
  0x1d   :  { %253 = vmatpush.bf16.msra.mxu1 %v489_v5  ;;  %v514_v42 = vld [vmem:[%s735_s6] ss:$0 sm:$0xff] }
  0x1e   :  { %337 = vmatpush.bf16.msra.mxu2 %v498_v18 }
  0x20   :  { %169 = vmatpush.bf16.msra.mxu0 %v480_v6 }
  0x21   :  { %254 = vmatpush.bf16.msra.mxu1 %v488_v7 }
  0x22   :  { %338 = vmatpush.bf16.msra.mxu2 %v497_v19 }
  0x24   :  { %170 = vmatpush.bf16.msra.mxu0 %v479_v8 }
  0x25   :  { %255 = vmatpush.bf16.msra.mxu1 %v487_v13 }
  0x26   :  { %339 = vmatpush.bf16.msra.mxu2 %v496_v20 }
  0x28   :  { %171 = vmatpush.bf16.msra.mxu0 %v478_v9 }
  0x29   :  { %256 = vmatpush.bf16.msra.mxu1 %v486_v14 }
  0x2a   :  { %340 = vmatpush.bf16.msra.mxu2 %v495_v29 }
  0x2c   :  { %172 = vmatpush.bf16.msra.mxu0 %v477_v10 }
  0x2d   :  { %257 = vmatpush.bf16.msra.mxu1 %v485_v15 }
  0x2e   :  { %341 = vmatpush.bf16.msra.mxu2 %v494_v30 }
  0x30   :  { %173 = vmatpush.bf16.msra.mxu0 %v476_v11 }
  0x31   :  { %258 = vmatpush.bf16.msra.mxu1 %v484_v16 }
  0x32   :  { %342 = vmatpush.bf16.msra.mxu2 %v493_v31 }
  0x33   :  { %174 = vmatmul.bf16.vlgmr.msra.gmra.mxu0 %v475_v12 }
  0x36   :  { %343 = vmatpush.bf16.msra.mxu2 %v492_v32 }
  0xb0   :  { %v175_v21 = vpop.f32.mrf.mxu0 }
  0xb1   :  { %v176_v23 = vadd.f32 %v512_v22, %v175_v21 }
  0xb3   :  { %v180_v26 = vmax.f32 %v176_v23, 0.0 }
  0xb8   :  { %v177_v24 = vpop.f32.mrf.mxu0 }
  0xb9   :  { %v178_v25 = vadd.f32 %v512_v22, %v177_v24 }
  0xbb   :  { %v181_v27 = vmax.f32 %v178_v25, 0.0 }
  0xbd   :  { %v182_v28 = vpack.c.bf16 %v181_v27, %v180_v26 }
  0xbf   :  { %259 = vmatmul.bf16.vlgmr.msra.gmra.mxu1 %v182_v28 }
 0x13c   :  { %v260_v33 = vpop.f32.mrf.mxu1 }
 0x13d   :  { %v261_v35 = vadd.f32 %v513_v34, %v260_v33 }
 0x13f   :  { %v265_v38 = vmax.f32 %v261_v35, 0.0 }
 0x144   :  { %v262_v36 = vpop.f32.mrf.mxu1 }
 0x145   :  { %v263_v37 = vadd.f32 %v513_v34, %v262_v36 }
 0x147   :  { %v266_v39 = vmax.f32 %v263_v37, 0.0 }
 0x149   :  { %v267_v40 = vpack.c.bf16 %v266_v39, %v265_v38 }
 0x14b   :  { %344 = vmatmul.bf16.vlgmr.msra.gmra.mxu2 %v267_v40 }
 0x1ce   :  { %v345_v41 = vpop.f32.mrf.mxu2 }
 0x1cf   :  { %v346_v44 = vadd.f32 %v514_v42, %v345_v41 }
 0x1d6   :  { %v347_v43 = vpop.f32.mrf.mxu2 }
 0x1d7   :  { %v348_v45 = vadd.f32 %v514_v42, %v347_v43 }
 0x1d9   :  { %v503_v46 = vpack.c.bf16 %v348_v45, %v346_v44 }
 0x1db   :  { %504 = vst [vmem:[#allocation10] sm:$0xff] %v503_v46  }
 0x1dc   :  { %366 = dma.vmem_to_hbm [thread:$0]  %s359_s25, 128, %s361_s28, [#allocation4], %s644_s9, %s644_s9, %s645_s10  }
 0x1dd   :  { %641 = dma.done.wait [#allocation4], 128  }
 0x1de   :  { %642 = vsyncadd [#allocation4], 4294967168 }
 0x1df   :  { %371 = vsyncpa [#allocation3], 1 }
 0x1e0   :  { %372 = vsyncpa [#allocation6], 1 }
 0x1e1   :  { %373 = vsyncpa [#allocation9], 1 }
 0x1e2   :  { %374 = vsyncpa [#allocation4], 1 }

</bundles_post_ra>
